<compile_context>
chip_gen: v7x
topology: tpu7x:2x2x1
jax: 0.10.0
libtpu: 0.0.40
codegen_flags: <defaults>
</compile_context>

<pallas_src>
import functools

import jax
import jax.numpy as jnp
from jax.experimental import pallas as pl
from jax.experimental.pallas import tpu as pltpu


def _round_up(x, m):
    return (x + m - 1) // m * m


def _ngram_ffnn_kernel(emb_ref, w1_ref, b1_ref, w2_ref, b2_ref, out_ref):
    # emb_ref: (TB, Cin) bf16   w1_ref: (Cin, H) bf16 (BN folded)   b1_ref: (1, H) f32
    # w2_ref:  (H, V)  bf16     b2_ref: (1, V) f32                  out_ref: (TB, V) f32
    x = emb_ref[...]

    # fc1 (+ folded BatchNorm), f32 accumulation on the MXU.
    h = jnp.dot(x, w1_ref[...], preferred_element_type=jnp.float32) + b1_ref[...]

    # ReLU (dropout is identity in eval mode).
    h = jnp.maximum(h, 0.0)

    # fc4, bf16 inputs / f32 accumulation.
    logits = jnp.dot(h.astype(jnp.bfloat16), w2_ref[...],
                     preferred_element_type=jnp.float32) + b2_ref[...]

    # log_softmax along dim=1 (padded vocab columns carry a -1e30 bias -> exp == 0).
    m = jnp.max(logits, axis=-1, keepdims=True)
    z = logits - m
    lse = jnp.log(jnp.sum(jnp.exp(z), axis=-1, keepdims=True))
    out_ref[...] = z - lse


@functools.partial(jax.jit, static_argnames=())
def ngram_ffnn_forward(inputs, params):
    """inputs: (B, context_size) int32 token ids. Returns (B, vocab) f32 log-probs."""
    emb_table = params["embedding"]          # (V, E)
    w1 = params["w1"]                        # (C*E, 128)
    b1 = params["b1"]                        # (128,)
    gamma = params["bn_gamma"]               # (128,)
    beta = params["bn_beta"]                 # (128,)
    rmean = params["bn_mean"]                # (128,)
    rvar = params["bn_var"]                  # (128,)
    w2 = params["w2"]                        # (128, V)
    b2 = params["b2"]                        # (V,)

    B = inputs.shape[0]
    Cin, H = w1.shape
    V = w2.shape[1]

    # ---- Fold BatchNorm1d (eval) into fc1 weight/bias (f32, one-time) --------
    eps = 1e-5
    scale = gamma / jnp.sqrt(rvar + eps)                     # (H,)
    w1_f = w1 * scale[None, :]                               # (Cin, H)
    b1_f = (b1 - rmean) * scale + beta                       # (H,)

    # ---- Shape padding for lane-dense MXU tiles ------------------------------
    Cin_p = _round_up(Cin, 128)
    V_p = _round_up(V, 128)

    if B >= 512:
        TB = 256
    elif B >= 128:
        TB = 128
    else:
        TB = _round_up(B, 16)                # bf16 sublane-friendly batch tile
    B_p = _round_up(B, TB)

    # Embedding gather + flatten in plain JAX, then pad & cast to bf16.
    embeds = emb_table[inputs].reshape(B, Cin).astype(jnp.float32)
    embeds = jnp.pad(embeds, ((0, B_p - B), (0, Cin_p - Cin))).astype(jnp.bfloat16)

    w1_p = jnp.pad(w1_f, ((0, Cin_p - Cin), (0, 0))).astype(jnp.bfloat16)   # (Cin_p, H)
    w2_p = jnp.pad(w2, ((0, 0), (0, V_p - V))).astype(jnp.bfloat16)         # (H, V_p)
    b1_2d = b1_f.reshape(1, H).astype(jnp.float32)
    # Padded vocab columns get a huge negative bias so they never affect softmax.
    b2_p = jnp.pad(b2.astype(jnp.float32), (0, V_p - V),
                   constant_values=-1e30).reshape(1, V_p)

    n_tiles = B_p // TB

    # ---- VMEM budget estimate (weights resident + double-buffered tiles) -----
    weight_bytes = Cin_p * H * 2 + H * V_p * 2 + (H + V_p) * 4
    tile_bytes = 2 * (TB * Cin_p * 2) + 2 * (TB * V_p * 4)
    est = 2 * weight_bytes + tile_bytes
    vmem_limit = int(min(max(int(est * 1.5) + (2 << 20), 32 << 20), 100 << 20))

    cost = pl.CostEstimate(
        flops=2 * B_p * Cin_p * H + 2 * B_p * H * V_p,
        transcendentals=B_p * V_p,
        bytes_accessed=(B_p * Cin_p * 2 + Cin_p * H * 2 + H * V_p * 2
                        + (H + V_p) * 4 + B_p * V_p * 4),
    )

    out = pl.pallas_call(
        _ngram_ffnn_kernel,
        out_shape=jax.ShapeDtypeStruct((B_p, V_p), jnp.float32),
        grid=(n_tiles,),
        in_specs=[
            pl.BlockSpec((TB, Cin_p), lambda i: (i, 0)),   # embeds: tiled over batch
            pl.BlockSpec((Cin_p, H), lambda i: (0, 0)),    # w1 (BN folded), resident
            pl.BlockSpec((1, H), lambda i: (0, 0)),        # b1 (BN folded), resident
            pl.BlockSpec((H, V_p), lambda i: (0, 0)),      # w2, resident
            pl.BlockSpec((1, V_p), lambda i: (0, 0)),      # b2, resident
        ],
        out_specs=pl.BlockSpec((TB, V_p), lambda i: (i, 0)),
        compiler_params=pltpu.CompilerParams(
            dimension_semantics=("parallel",),
            vmem_limit_bytes=vmem_limit,
        ),
        cost_estimate=cost,
    )(embeds, w1_p, b1_2d, w2_p, b2_p)

    return out[:B, :V]


def init_params(key, vocab_size, embedding_dim, context_size, hidden=128):
    ks = jax.random.split(key, 8)
    cin = context_size * embedding_dim
    params = {
        "embedding": jax.random.normal(ks[0], (vocab_size, embedding_dim), jnp.float32),
        "w1": jax.random.normal(ks[1], (cin, hidden), jnp.float32) / jnp.sqrt(cin),
        "b1": jax.random.normal(ks[2], (hidden,), jnp.float32) * 0.01,
        "bn_gamma": 1.0 + 0.1 * jax.random.normal(ks[3], (hidden,), jnp.float32),
        "bn_beta": 0.1 * jax.random.normal(ks[4], (hidden,), jnp.float32),
        "bn_mean": 0.05 * jax.random.normal(ks[5], (hidden,), jnp.float32),
        "bn_var": jnp.abs(1.0 + 0.1 * jax.random.normal(ks[6], (hidden,), jnp.float32)),
        "w2": jax.random.normal(ks[7], (hidden, vocab_size), jnp.float32) / jnp.sqrt(hidden),
        "b2": jnp.zeros((vocab_size,), jnp.float32),
    }
    return params


if __name__ == "__main__":
    vocab_size = 128
    embedding_dim = 16
    context_size = 8
    batch = 8

    key = jax.random.PRNGKey(0)
    pkey, ikey = jax.random.split(key)
    params = init_params(pkey, vocab_size, embedding_dim, context_size)
    inputs = jax.random.randint(ikey, (batch, context_size), 0, vocab_size, dtype=jnp.int32)

    log_probs = ngram_ffnn_forward(inputs, params)
    jax.block_until_ready(log_probs)

    # Pure-JAX f32 reference (same eval-mode semantics). Tolerance is loose
    # because the kernel runs its matmuls with bf16 operands / f32 accumulation.
    emb = params["embedding"][inputs].reshape(batch, -1)
    h = emb @ params["w1"] + params["b1"]
    h = (h - params["bn_mean"]) / jnp.sqrt(params["bn_var"] + 1e-5)
    h = h * params["bn_gamma"] + params["bn_beta"]
    h = jnp.maximum(h, 0.0)
    logits = h @ params["w2"] + params["b2"]
    ref = jax.nn.log_softmax(logits, axis=1)

    assert log_probs.shape == (batch, vocab_size)
    assert bool(jnp.all(jnp.isfinite(log_probs))), "non-finite output"
    assert jnp.allclose(log_probs, ref, atol=5e-2, rtol=5e-2), "mismatch vs reference"

    print("KERNEL_OK")
</pallas_src>

<mosaic_0001>
module attributes {stable_mosaic.version = 11 : i64} {
  func.func @_ngram_ffnn_kernel(%arg0: i32, %arg1: memref<16x128xbf16, #tpu.memory_space<vmem>>, %arg2: memref<128x128xbf16, #tpu.memory_space<vmem>>, %arg3: memref<1x128xf32, #tpu.memory_space<vmem>>, %arg4: memref<128x128xbf16, #tpu.memory_space<vmem>>, %arg5: memref<1x128xf32, #tpu.memory_space<vmem>>, %arg6: memref<16x128xf32, #tpu.memory_space<vmem>>) attributes {dimension_semantics = [#tpu.dimension_semantics<parallel>], iteration_bounds = array<i64: 1>, scalar_prefetch = 0 : i64, scratch_operands = 0 : i64, tpu.core_type = #tpu.core_type<tc>, window_params = [{transform_indices = @transform_0, window_bounds = array<i64: 16, 128>}, {pipeline_mode = #tpu.pipeline_mode<synchronous>, transform_indices = @transform_1, window_bounds = array<i64: 128, 128>}, {pipeline_mode = #tpu.pipeline_mode<synchronous>, transform_indices = @transform_2, window_bounds = array<i64: 1, 128>}, {pipeline_mode = #tpu.pipeline_mode<synchronous>, transform_indices = @transform_3, window_bounds = array<i64: 128, 128>}, {pipeline_mode = #tpu.pipeline_mode<synchronous>, transform_indices = @transform_4, window_bounds = array<i64: 1, 128>}, {transform_indices = @transform_5, window_bounds = array<i64: 16, 128>}]} {
    %c0 = arith.constant 0 : index
    %c0_0 = arith.constant 0 : index
    %0 = vector.load %arg1[%c0, %c0_0] : memref<16x128xbf16, #tpu.memory_space<vmem>>, vector<16x128xbf16>
    %c0_1 = arith.constant 0 : index
    %c0_2 = arith.constant 0 : index
    %1 = vector.load %arg2[%c0_1, %c0_2] : memref<128x128xbf16, #tpu.memory_space<vmem>>, vector<128x128xbf16>
    %cst = arith.constant dense<0.000000e+00> : vector<16x128xf32>
    %2 = tpu.matmul %0, %1, %cst {dimension_numbers = #tpu.dot_dimension_numbers<[1], [0], [0], [1], [0, 0, 1, 1], [], []>} : vector<16x128xbf16>, vector<128x128xbf16>, vector<16x128xf32> -> vector<16x128xf32>
    %c0_3 = arith.constant 0 : index
    %c0_4 = arith.constant 0 : index
    %3 = vector.load %arg3[%c0_3, %c0_4] : memref<1x128xf32, #tpu.memory_space<vmem>>, vector<1x128xf32>
    %4 = vector.broadcast %3 : vector<1x128xf32> to vector<16x128xf32>
    %5 = arith.addf %2, %4 : vector<16x128xf32>
    %cst_5 = arith.constant 0.000000e+00 : f32
    %6 = vector.broadcast %cst_5 : f32 to vector<16x128xf32>
    %7 = arith.maximumf %5, %6 : vector<16x128xf32>
    %8 = arith.truncf %7 : vector<16x128xf32> to vector<16x128xbf16>
    %c0_6 = arith.constant 0 : index
    %c0_7 = arith.constant 0 : index
    %9 = vector.load %arg4[%c0_6, %c0_7] : memref<128x128xbf16, #tpu.memory_space<vmem>>, vector<128x128xbf16>
    %cst_8 = arith.constant dense<0.000000e+00> : vector<16x128xf32>
    %10 = tpu.matmul %8, %9, %cst_8 {dimension_numbers = #tpu.dot_dimension_numbers<[1], [0], [0], [1], [0, 0, 1, 1], [], []>} : vector<16x128xbf16>, vector<128x128xbf16>, vector<16x128xf32> -> vector<16x128xf32>
    %c0_9 = arith.constant 0 : index
    %c0_10 = arith.constant 0 : index
    %11 = vector.load %arg5[%c0_9, %c0_10] : memref<1x128xf32, #tpu.memory_space<vmem>>, vector<1x128xf32>
    %12 = vector.broadcast %11 : vector<1x128xf32> to vector<16x128xf32>
    %13 = arith.addf %10, %12 : vector<16x128xf32>
    %cst_11 = arith.constant dense<0xFF800000> : vector<16xf32>
    %14 = vector.multi_reduction <maximumf>, %13, %cst_11 [1] : vector<16x128xf32> to vector<16xf32>
    %15 = vector.shape_cast %14 : vector<16xf32> to vector<16x1xf32>
    %16 = vector.broadcast %15 : vector<16x1xf32> to vector<16x128xf32>
    %17 = arith.subf %13, %16 : vector<16x128xf32>
    %18 = math.exp %17 : vector<16x128xf32>
    %cst_12 = arith.constant dense<0.000000e+00> : vector<16xf32>
    %19 = vector.multi_reduction <add>, %18, %cst_12 [1] : vector<16x128xf32> to vector<16xf32>
    %20 = vector.shape_cast %19 : vector<16xf32> to vector<16x1xf32>
    %21 = math.log %20 : vector<16x1xf32>
    %22 = vector.broadcast %21 : vector<16x1xf32> to vector<16x128xf32>
    %23 = arith.subf %17, %22 : vector<16x128xf32>
    %c0_13 = arith.constant 0 : index
    %c0_14 = arith.constant 0 : index
    %24 = vector.load %arg6[%c0_13, %c0_14] : memref<16x128xf32, #tpu.memory_space<vmem>>, vector<16x128xf32>
    tpu.vector_store %arg6[%c0_13, %c0_14], %23 {strides = array<i32>} : memref<16x128xf32, #tpu.memory_space<vmem>>, vector<16x128xf32>,
    return
  }
  func.func @transform_0(%arg0: i32) -> (i32, i32) {
    %c0_i32 = arith.constant 0 : i32
    %c0_i32_0 = arith.constant 0 : i32
    return %arg0, %c0_i32 : i32, i32
  }
  func.func @transform_1(%arg0: i32) -> (i32, i32) {
    %c0_i32 = arith.constant 0 : i32
    %c0_i32_0 = arith.constant 0 : i32
    %c0_i32_1 = arith.constant 0 : i32
    return %c0_i32, %c0_i32_0 : i32, i32
  }
  func.func @transform_2(%arg0: i32) -> (i32, i32) {
    %c0_i32 = arith.constant 0 : i32
    %c0_i32_0 = arith.constant 0 : i32
    %c0_i32_1 = arith.constant 0 : i32
    return %c0_i32, %c0_i32_0 : i32, i32
  }
  func.func @transform_3(%arg0: i32) -> (i32, i32) {
    %c0_i32 = arith.constant 0 : i32
    %c0_i32_0 = arith.constant 0 : i32
    %c0_i32_1 = arith.constant 0 : i32
    return %c0_i32, %c0_i32_0 : i32, i32
  }
  func.func @transform_4(%arg0: i32) -> (i32, i32) {
    %c0_i32 = arith.constant 0 : i32
    %c0_i32_0 = arith.constant 0 : i32
    %c0_i32_1 = arith.constant 0 : i32
    return %c0_i32, %c0_i32_0 : i32, i32
  }
  func.func @transform_5(%arg0: i32) -> (i32, i32) {
    %c0_i32 = arith.constant 0 : i32
    %c0_i32_0 = arith.constant 0 : i32
    return %arg0, %c0_i32 : i32, i32
  }
}

</mosaic_0001>

<bundles_post_ra>
// kernel: ngram_ffnn_forward.1
= control target key start
LH: loop header
LB: loop body
LE: loop exit
PB: predicated region body
PF: predicated region fallthrough
CT: control target
= control target key end

     0   :  { %v386_v0 = vmov 0.0   ;;  %vm387_vm0 = vmmov 0   ;;  %s481_s1 = inlined_call_operand.vmem [shape: bf16[128,128], index: 1, kind: input, shape index: {}]   ;;  %s482_s3 = inlined_call_operand.vmem [shape: bf16[128,128], index: 3, kind: input, shape index: {}]   ;;  %s483_s0 = inlined_call_operand.vmem [shape: bf16[16,128], index: 0, kind: input, shape index: {}]   ;;  %s484_s2 = inlined_call_operand.vmem [shape: f32[1,128], index: 2, kind: input, shape index: {}]   ;;  %s485_s4 = inlined_call_operand.vmem [shape: f32[1,128], index: 4, kind: input, shape index: {}]   ;;  %s486_s5 = inlined_call_operand.vmem [shape: f32[16,128], index: 5, kind: output, shape index: {}]  }
   0x1   :  { %319 = vmatprep.subr.bf16.mxu0 %v386_v0  ;;  %v361_v1 = vld [vmem:[%s481_s1] sm:$0xff]   ;;  %335 = vmatprep.mubr.msk.bf16.mxu0 %vm387_vm0, %v386_v0  ;;  %v362_v2 = vld [vmem:[%s481_s1 + $0x8] sm:$0xff]   ;;  %v363_v3 = vld [vmem:[%s481_s1 + $0x10] sm:$0xff]  }
   0x2   :  { %339 = vmatprep.subr.bf16.mxu1 %v386_v0  ;;  %355 = vmatprep.mubr.msk.bf16.mxu1 %vm387_vm0, %v386_v0  ;;  %v370_v4 = vld [vmem:[%s482_s3] sm:$0xff]   ;;  %v364_v5 = vld [vmem:[%s481_s1 + $0x18] sm:$0xff]   ;;  %v371_v6 = vld [vmem:[%s482_s3 + $0x8] sm:$0xff]  }
   0x3   :  { %320 = vmatpush3.bf16.msra.mxu0 %v361_v1  ;;  %340 = vmatpush3.bf16.msra.mxu1 %v370_v4  ;;  %v365_v7 = vld [vmem:[%s481_s1 + $0x20] sm:$0xff]   ;;  %v372_v8 = vld [vmem:[%s482_s3 + $0x10] sm:$0xff]   ;;  %v366_v9 = vld [vmem:[%s481_s1 + $0x28] sm:$0xff]  }
   0x4   :  { %321 = vmatprep.subr.bf16.mxu0 %v386_v0  ;;  %341 = vmatprep.subr.bf16.mxu1 %v386_v0  ;;  %v373_v10 = vld [vmem:[%s482_s3 + $0x18] sm:$0xff]   ;;  %v367_v11 = vld [vmem:[%s481_s1 + $0x30] sm:$0xff]   ;;  %v374_v12 = vld [vmem:[%s482_s3 + $0x20] sm:$0xff]  }
   0x5   :  { %v368_v13 = vld [vmem:[%s481_s1 + $0x38] sm:$0xff]   ;;  %v375_v14 = vld [vmem:[%s482_s3 + $0x28] sm:$0xff]   ;;  %v369_v15 = vld [vmem:[%s483_s0] sm:$0xff]  }
   0x6   :  { %v376_v16 = vld [vmem:[%s482_s3 + $0x30] sm:$0xff]   ;;  %v377_v17 = vld [vmem:[%s482_s3 + $0x38] sm:$0xff]   ;;  %v282_v18 = vld [vmem:[%s484_s2] ss:$0 sm:$0xff] }
   0x7   :  { %322 = vmatpush3.bf16.msra.mxu0 %v362_v2  ;;  %342 = vmatpush3.bf16.msra.mxu1 %v371_v6  ;;  %v292_v28 = vld [vmem:[%s485_s4] ss:$0 sm:$0xff] }
   0x8   :  { %323 = vmatprep.subr.bf16.mxu0 %v386_v0  ;;  %343 = vmatprep.subr.bf16.mxu1 %v386_v0 }
   0xb   :  { %324 = vmatpush3.bf16.msra.mxu0 %v363_v3  ;;  %344 = vmatpush3.bf16.msra.mxu1 %v372_v8 }
   0xc   :  { %325 = vmatprep.subr.bf16.mxu0 %v386_v0  ;;  %345 = vmatprep.subr.bf16.mxu1 %v386_v0 }
   0xf   :  { %326 = vmatpush3.bf16.msra.mxu0 %v364_v5  ;;  %346 = vmatpush3.bf16.msra.mxu1 %v373_v10 }
  0x10   :  { %327 = vmatprep.subr.bf16.mxu0 %v386_v0  ;;  %347 = vmatprep.subr.bf16.mxu1 %v386_v0 }
  0x13   :  { %328 = vmatpush3.bf16.msra.mxu0 %v365_v7  ;;  %348 = vmatpush3.bf16.msra.mxu1 %v374_v12 }
  0x14   :  { %329 = vmatprep.subr.bf16.mxu0 %v386_v0  ;;  %349 = vmatprep.subr.bf16.mxu1 %v386_v0 }
  0x17   :  { %330 = vmatpush3.bf16.msra.mxu0 %v366_v9  ;;  %350 = vmatpush3.bf16.msra.mxu1 %v375_v14 }
  0x18   :  { %331 = vmatprep.subr.bf16.mxu0 %v386_v0  ;;  %351 = vmatprep.subr.bf16.mxu1 %v386_v0 }
  0x1b   :  { %332 = vmatpush3.bf16.msra.mxu0 %v367_v11  ;;  %352 = vmatpush3.bf16.msra.mxu1 %v376_v16 }
  0x1c   :  { %333 = vmatprep.subr.bf16.mxu0 %v386_v0  ;;  %353 = vmatprep.subr.bf16.mxu1 %v386_v0 }
  0x1f   :  { %334 = vmatpush3.bf16.msra.mxu0 %v368_v13  ;;  %354 = vmatpush3.bf16.msra.mxu1 %v377_v17 }
  0x22   :  { %336 = vmatmul.mubr.bf16.vlgmr.msra.gmra.mrb[0].mxu0 %v369_v15 }
  0xf5   :  { %v134_v19 = vpop.f32.mrb[0].mxu0 }
  0xf6   :  { %v135_v20 = vadd.f32 %v282_v18, %v134_v19  ;;  %v337_v21 = vpop.f32.mrb[1].mxu0 }
  0xf7   :  { %v137_v22 = vpop.f32.mrb[2].mxu0 }
  0xf8   :  { %v138_v23 = vadd.f32 %v282_v18, %v137_v22  ;;  %v338_v24 = vpop.f32.mrb[3].mxu0  ;;  %v141_v25 = vmax.f32 %v135_v20, 0.0 }
  0xfa   :  { %v142_v26 = vmax.f32 %v138_v23, 0.0 }
  0xfc   :  { %v143_v27 = vpack.c.bf16 %v142_v26, %v141_v25 }
  0xfe   :  { %356 = vmatmul.mubr.bf16.vlgmr.msra.gmra.mrb[0].mxu1 %v143_v27 }
 0x1d1   :  { %v249_v29 = vpop.f32.mrb[0].mxu1 }
 0x1d2   :  { %v250_v30 = vadd.f32 %v292_v28, %v249_v29  ;;  %v357_v31 = vpop.f32.mrb[1].mxu1 }
 0x1d3   :  { %v252_v32 = vpop.f32.mrb[2].mxu1 }
 0x1d4   :  { %256 = vmax.xlane.f32.xlu0 %v250_v30  ;;  %v358_v33 = vpop.f32.mrb[3].mxu1  ;;  %v253_v34 = vadd.f32 %v292_v28, %v252_v32 }
 0x1d8   :  { %258 = vmax.xlane.f32.xlu0 %v253_v34 }
 0x261   :  { %v257_v35 = vpop.xlane.xlu0 %256 }
 0x262   :  { %v260_v36 = vsub.f32 %v250_v30, %v257_v35 }
 0x264   :  { %v262_v37 = vmul.f32 1.442695, %v260_v36 }
 0x265   :  { %v259_v38 = vpop.xlane.xlu0 %258 }
 0x266   :  { %v261_v39 = vsub.f32 %v253_v34, %v259_v38  ;;  %378 = vpow2.f32 %v262_v37 }
 0x268   :  { %v264_v40 = vmul.f32 1.442695, %v261_v39 }
 0x26a   :  { %380 = vpow2.f32 %v264_v40 }
 0x270   :  { %v379_v41 = vpop.eup %378 }
 0x271   :  { %266 = vadd.xlane.f32.xlu1 %v379_v41 }
 0x274   :  { %v381_v42 = vpop.eup %380 }
 0x275   :  { %268 = vadd.xlane.f32.xlu1 %v381_v42 }
 0x2fe   :  { %v267_v43 = vpop.xlane.xlu1 %266 }
 0x2ff   :  { %382 = vlog2.f32 %v267_v43 }
 0x302   :  { %v269_v44 = vpop.xlane.xlu1 %268 }
 0x303   :  { %384 = vlog2.f32 %v269_v44 }
 0x309   :  { %v383_v45 = vpop.eup %382 }
 0x30a   :  { %v271_v46 = vmul.f32 0.6931472, %v383_v45 }
 0x30c   :  { %v274_v47 = vsub.f32 %v260_v36, %v271_v46 }
 0x30d   :  { %v385_v48 = vpop.eup %384 }
 0x30e   :  { %276 = vst [vmem:[%s486_s5] sm:$0xff] %v274_v47  ;;  %v273_v49 = vmul.f32 0.6931472, %v385_v48 }
 0x310   :  { %v275_v50 = vsub.f32 %v261_v39, %v273_v49 }
 0x312   :  { %277 = vst [vmem:[%s486_s5 + $0x8] sm:$0xff] %v275_v50 }

</bundles_post_ra>
